<compile_context>
chip_gen: v6e
topology: v6e:2x2x1
jax: 0.10.0
libtpu: 0.0.40
codegen_flags: <defaults>
</compile_context>

<pallas_src>
import functools

import jax
import jax.numpy as jnp
from jax.experimental import pallas as pl
from jax.experimental.pallas import tpu as pltpu


def _round_up(x, m):
    return ((x + m - 1) // m) * m


def _bert_self_output_kernel(x_ref, res_ref, w_ref, b_ref, g_ref, beta_ref,
                             o_ref, *, eps, mxu_dtype=None):
    # x_ref   : (TM, H) hidden_states tile (native dtype -> MXU)
    # res_ref : (TM, H) residual (input_tensor) tile
    # w_ref   : (H, H)  dense weight (in, out), native dtype, fetched once
    # b_ref, g_ref, beta_ref : (1, H) f32
    # o_ref   : (TM, H)
    h_dim = x_ref.shape[-1]
    inv_h = 1.0 / float(h_dim)

    xv = x_ref[...]
    wv = w_ref[...]
    if mxu_dtype is not None:
        # v5e option: feed the MXU bf16 operands; accumulation stays f32.
        xv = xv.astype(mxu_dtype)
        wv = wv.astype(mxu_dtype)

    # Dense: x @ W with f32 accumulation on the MXU.
    acc = jnp.dot(xv, wv, preferred_element_type=jnp.float32)
    y = acc + b_ref[...].astype(jnp.float32) + res_ref[...].astype(jnp.float32)

    # TODO(synk): dropout omitted (inference / eval mode => identity).

    # Two-pass LayerNorm over the hidden axis (biased variance, eps inside
    # rsqrt — matches torch.nn.LayerNorm).
    mean = jnp.sum(y, axis=-1, keepdims=True) * inv_h
    yc = y - mean
    var = jnp.sum(yc * yc, axis=-1, keepdims=True) * inv_h
    inv = jax.lax.rsqrt(var + eps)
    out = yc * inv * g_ref[...].astype(jnp.float32) + beta_ref[...].astype(jnp.float32)

    o_ref[...] = out.astype(o_ref.dtype)


def prepare_bert_self_output_params(w, b, gamma, beta, *, param_dtype):
    """Cast/reshape parameters once. Cache the result across calls — do NOT
    redo the W cast inside the per-call path (it costs a full HBM round-trip
    of W on a memory-bound kernel)."""
    H = w.shape[0]
    return (w.astype(param_dtype),
            b.reshape(1, H).astype(jnp.float32),
            gamma.reshape(1, H).astype(jnp.float32),
            beta.reshape(1, H).astype(jnp.float32))


def bert_self_output(hidden_states, input_tensor, w2, b2, g2, beta2,
                     *, eps=1e-12, row_tile=512, mxu_dtype=None):
    """hidden_states, input_tensor: [B, S, H].
    w2/b2/g2/beta2: prepared params from prepare_bert_self_output_params
    (w2: [H, H] (in, out) in the activation dtype; b2/g2/beta2: [1, H] f32).
    """
    B, S, H = hidden_states.shape
    M = B * S
    out_dtype = hidden_states.dtype

    x2 = hidden_states.reshape(M, H)
    r2 = input_tensor.reshape(M, H)

    # Row tile: multiple of 8, no bigger than row_tile, and small enough that
    # the 1-D "parallel" grid has at least 2 steps (so both v7x TensorCores get
    # work for small M). Ragged last block handled by Pallas masking — no pad.
    tm = max(8, min(_round_up(row_tile, 8), _round_up(pl.cdiv(M, 2), 8)))
    grid = (pl.cdiv(M, tm),)

    act_bytes = jnp.dtype(out_dtype).itemsize
    w_bytes = H * H * jnp.dtype(w2.dtype).itemsize
    tile_bytes = tm * H * act_bytes
    # double-buffered activation tiles (x, res, out) + weight + small vectors
    # + headroom for the f32 epilogue temporaries.
    vmem_est = 3 * 2 * tile_bytes + 2 * w_bytes + 6 * H * 4 + 4 * tm * H * 4

    # Per-generation scoped-VMEM cap: ~75% of physical VMEM when queryable,
    # conservative 48 MiB otherwise (safe on v5e/v6e/v7x).
    vmem_cap = 48 * 1024 * 1024
    try:
        vmem_cap = int(pltpu.get_tpu_info().vmem_capacity_bytes * 3 // 4)
    except Exception:
        pass
    vmem_limit = int(min(vmem_cap,
                         max(32 * 1024 * 1024, vmem_est + vmem_est // 4)))

    cost = pl.CostEstimate(
        flops=2 * M * H * H + 10 * M * H,
        transcendentals=M,
        bytes_accessed=3 * M * H * act_bytes + w_bytes + 3 * H * 4,
    )

    kernel = functools.partial(_bert_self_output_kernel, eps=eps,
                               mxu_dtype=mxu_dtype)

    out2 = pl.pallas_call(
        kernel,
        out_shape=jax.ShapeDtypeStruct((M, H), out_dtype),
        grid=grid,
        in_specs=[
            pl.BlockSpec((tm, H), lambda i: (i, 0)),   # hidden_states tile
            pl.BlockSpec((tm, H), lambda i: (i, 0)),   # residual tile
            pl.BlockSpec((H, H), lambda i: (0, 0)),    # dense weight (constant index -> DMA'd once)
            pl.BlockSpec((1, H), lambda i: (0, 0)),    # dense bias
            pl.BlockSpec((1, H), lambda i: (0, 0)),    # LN gamma
            pl.BlockSpec((1, H), lambda i: (0, 0)),    # LN beta
        ],
        out_specs=pl.BlockSpec((tm, H), lambda i: (i, 0)),
        compiler_params=pltpu.CompilerParams(
            dimension_semantics=("parallel",),
            vmem_limit_bytes=vmem_limit),
        cost_estimate=cost,
    )(x2, r2, w2, b2, g2, beta2)

    return out2.reshape(B, S, H)


def _reference(hidden_states, input_tensor, w, b, gamma, beta, eps=1e-12):
    h = jnp.einsum("bsh,hk->bsk", hidden_states, w) + b
    y = h + input_tensor
    mean = jnp.mean(y, axis=-1, keepdims=True)
    var = jnp.mean((y - mean) ** 2, axis=-1, keepdims=True)
    return (y - mean) * jax.lax.rsqrt(var + eps) * gamma + beta


if __name__ == "__main__":
    # Small config consistent with the module: batch=2, seq=8, hidden=32.
    # NOTE: H=32 runs with masked (25% lane) stores — real configs use
    # H=768/1024 (multiples of 128) and are lane-dense; this shape is only a
    # correctness smoke test, not a performance proxy.
    H = 32
    eps = 1e-12

    key = jax.random.PRNGKey(0)
    k1, k2, k3, k4 = jax.random.split(key, 4)

    # Deterministic params (Linear weight ~ U(-1/sqrt(H), 1/sqrt(H)), LN gamma=1, beta=0)
    bound = 1.0 / (H ** 0.5)
    w = jax.random.uniform(k3, (H, H), minval=-bound, maxval=bound, dtype=jnp.float32)
    b = jax.random.uniform(k4, (H,), minval=-bound, maxval=bound, dtype=jnp.float32)
    gamma = jnp.ones((H,), dtype=jnp.float32)
    beta = jnp.zeros((H,), dtype=jnp.float32)

    # Prepare (cast/reshape) parameters once — cached across calls.
    w2, b2, g2, beta2 = prepare_bert_self_output_params(
        w, b, gamma, beta, param_dtype=jnp.float32)

    ok = True
    # (B, S) = (2, 8): exact tiling.  (2, 7): ragged final block (masked rows).
    for (B, S) in [(2, 8), (2, 7)]:
        hidden_states = jax.random.normal(k1, (B, S, H), dtype=jnp.float32)
        input_tensor = jax.random.normal(k2, (B, S, H), dtype=jnp.float32)

        out = bert_self_output(hidden_states, input_tensor, w2, b2, g2, beta2,
                               eps=eps)
        out = jax.block_until_ready(out)

        ref = _reference(hidden_states, input_tensor, w, b, gamma, beta, eps=eps)
        ok = ok and bool(jnp.allclose(out, ref, atol=1e-5, rtol=1e-4))

    assert ok, "mismatch vs reference"
    print("KERNEL_OK")
</pallas_src>

<mosaic_0001>
module attributes {stable_mosaic.version = 11 : i64} {
  func.func @_bert_self_output_kernel(%arg0: i32, %arg1: memref<8x32xf32, #tpu.memory_space<vmem>>, %arg2: memref<8x32xf32, #tpu.memory_space<vmem>>, %arg3: memref<32x32xf32, #tpu.memory_space<vmem>>, %arg4: memref<1x32xf32, #tpu.memory_space<vmem>>, %arg5: memref<1x32xf32, #tpu.memory_space<vmem>>, %arg6: memref<1x32xf32, #tpu.memory_space<vmem>>, %arg7: memref<8x32xf32, #tpu.memory_space<vmem>>) attributes {dimension_semantics = [#tpu.dimension_semantics<parallel>], iteration_bounds = array<i64: 2>, scalar_prefetch = 0 : i64, scratch_operands = 0 : i64, tpu.core_type = #tpu.core_type<tc>, window_params = [{transform_indices = @transform_0, window_bounds = array<i64: 8, 32>}, {transform_indices = @transform_1, window_bounds = array<i64: 8, 32>}, {pipeline_mode = #tpu.pipeline_mode<synchronous>, transform_indices = @transform_2, window_bounds = array<i64: 32, 32>}, {pipeline_mode = #tpu.pipeline_mode<synchronous>, transform_indices = @transform_3, window_bounds = array<i64: 1, 32>}, {pipeline_mode = #tpu.pipeline_mode<synchronous>, transform_indices = @transform_4, window_bounds = array<i64: 1, 32>}, {pipeline_mode = #tpu.pipeline_mode<synchronous>, transform_indices = @transform_5, window_bounds = array<i64: 1, 32>}, {transform_indices = @transform_6, window_bounds = array<i64: 8, 32>}]} {
    %c0 = arith.constant 0 : index
    %c0_0 = arith.constant 0 : index
    %0 = vector.load %arg1[%c0, %c0_0] : memref<8x32xf32, #tpu.memory_space<vmem>>, vector<8x32xf32>
    %c0_1 = arith.constant 0 : index
    %c0_2 = arith.constant 0 : index
    %1 = vector.load %arg3[%c0_1, %c0_2] : memref<32x32xf32, #tpu.memory_space<vmem>>, vector<32x32xf32>
    %cst = arith.constant dense<0.000000e+00> : vector<8x32xf32>
    %2 = tpu.matmul %0, %1, %cst {dimension_numbers = #tpu.dot_dimension_numbers<[1], [0], [0], [1], [0, 0, 1, 1], [], []>} : vector<8x32xf32>, vector<32x32xf32>, vector<8x32xf32> -> vector<8x32xf32>
    %c0_3 = arith.constant 0 : index
    %c0_4 = arith.constant 0 : index
    %3 = vector.load %arg4[%c0_3, %c0_4] : memref<1x32xf32, #tpu.memory_space<vmem>>, vector<1x32xf32>
    %4 = vector.broadcast %3 : vector<1x32xf32> to vector<8x32xf32>
    %5 = arith.addf %2, %4 : vector<8x32xf32>
    %c0_5 = arith.constant 0 : index
    %c0_6 = arith.constant 0 : index
    %6 = vector.load %arg2[%c0_5, %c0_6] : memref<8x32xf32, #tpu.memory_space<vmem>>, vector<8x32xf32>
    %7 = arith.addf %5, %6 : vector<8x32xf32>
    %cst_7 = arith.constant dense<0.000000e+00> : vector<8xf32>
    %8 = vector.multi_reduction <add>, %7, %cst_7 [1] : vector<8x32xf32> to vector<8xf32>
    %9 = vector.shape_cast %8 : vector<8xf32> to vector<8x1xf32>
    %cst_8 = arith.constant 3.125000e-02 : f32
    %10 = vector.broadcast %cst_8 : f32 to vector<8x1xf32>
    %11 = arith.mulf %9, %10 : vector<8x1xf32>
    %12 = vector.broadcast %11 : vector<8x1xf32> to vector<8x32xf32>
    %13 = arith.subf %7, %12 : vector<8x32xf32>
    %14 = arith.mulf %13, %13 : vector<8x32xf32>
    %cst_9 = arith.constant dense<0.000000e+00> : vector<8xf32>
    %15 = vector.multi_reduction <add>, %14, %cst_9 [1] : vector<8x32xf32> to vector<8xf32>
    %16 = vector.shape_cast %15 : vector<8xf32> to vector<8x1xf32>
    %cst_10 = arith.constant 3.125000e-02 : f32
    %17 = vector.broadcast %cst_10 : f32 to vector<8x1xf32>
    %18 = arith.mulf %16, %17 : vector<8x1xf32>
    %cst_11 = arith.constant 9.99999996E-13 : f32
    %19 = vector.broadcast %cst_11 : f32 to vector<8x1xf32>
    %20 = arith.addf %18, %19 : vector<8x1xf32>
    %21 = math.rsqrt %20 : vector<8x1xf32>
    %22 = vector.broadcast %21 : vector<8x1xf32> to vector<8x32xf32>
    %23 = arith.mulf %13, %22 : vector<8x32xf32>
    %c0_12 = arith.constant 0 : index
    %c0_13 = arith.constant 0 : index
    %24 = vector.load %arg5[%c0_12, %c0_13] : memref<1x32xf32, #tpu.memory_space<vmem>>, vector<1x32xf32>
    %25 = vector.broadcast %24 : vector<1x32xf32> to vector<8x32xf32>
    %26 = arith.mulf %23, %25 : vector<8x32xf32>
    %c0_14 = arith.constant 0 : index
    %c0_15 = arith.constant 0 : index
    %27 = vector.load %arg6[%c0_14, %c0_15] : memref<1x32xf32, #tpu.memory_space<vmem>>, vector<1x32xf32>
    %28 = vector.broadcast %27 : vector<1x32xf32> to vector<8x32xf32>
    %29 = arith.addf %26, %28 : vector<8x32xf32>
    %c0_16 = arith.constant 0 : index
    %c0_17 = arith.constant 0 : index
    %30 = vector.load %arg7[%c0_16, %c0_17] : memref<8x32xf32, #tpu.memory_space<vmem>>, vector<8x32xf32>
    tpu.vector_store %arg7[%c0_16, %c0_17], %29 {strides = array<i32>} : memref<8x32xf32, #tpu.memory_space<vmem>>, vector<8x32xf32>,
    return
  }
  func.func @transform_0(%arg0: i32) -> (i32, i32) {
    %c0_i32 = arith.constant 0 : i32
    %c0_i32_0 = arith.constant 0 : i32
    return %arg0, %c0_i32 : i32, i32
  }
  func.func @transform_1(%arg0: i32) -> (i32, i32) {
    %c0_i32 = arith.constant 0 : i32
    %c0_i32_0 = arith.constant 0 : i32
    return %arg0, %c0_i32 : i32, i32
  }
  func.func @transform_2(%arg0: i32) -> (i32, i32) {
    %c0_i32 = arith.constant 0 : i32
    %c0_i32_0 = arith.constant 0 : i32
    %c0_i32_1 = arith.constant 0 : i32
    return %c0_i32, %c0_i32_0 : i32, i32
  }
  func.func @transform_3(%arg0: i32) -> (i32, i32) {
    %c0_i32 = arith.constant 0 : i32
    %c0_i32_0 = arith.constant 0 : i32
    %c0_i32_1 = arith.constant 0 : i32
    return %c0_i32, %c0_i32_0 : i32, i32
  }
  func.func @transform_4(%arg0: i32) -> (i32, i32) {
    %c0_i32 = arith.constant 0 : i32
    %c0_i32_0 = arith.constant 0 : i32
    %c0_i32_1 = arith.constant 0 : i32
    return %c0_i32, %c0_i32_0 : i32, i32
  }
  func.func @transform_5(%arg0: i32) -> (i32, i32) {
    %c0_i32 = arith.constant 0 : i32
    %c0_i32_0 = arith.constant 0 : i32
    %c0_i32_1 = arith.constant 0 : i32
    return %c0_i32, %c0_i32_0 : i32, i32
  }
  func.func @transform_6(%arg0: i32) -> (i32, i32) {
    %c0_i32 = arith.constant 0 : i32
    %c0_i32_0 = arith.constant 0 : i32
    return %arg0, %c0_i32 : i32, i32
  }
}

</mosaic_0001>

<bundles_post_ra>
// kernel: tpu_custom_call.1
= control target key start
LH: loop header
LB: loop body
LE: loop exit
PB: predicated region body
PF: predicated region fallthrough
CT: control target
= control target key end

     0   :  { %s1067_s0 = inlined_call_operand.hbm [shape: f32[16,32], index: 0, kind: input, shape index: {}]   ;;  %s1068_s1 = inlined_call_operand.hbm [shape: f32[16,32], index: 1, kind: input, shape index: {}]   ;;  %s1069_s2 = inlined_call_operand.hbm [shape: f32[32,32], index: 2, kind: input, shape index: {}]   ;;  %s1070_s3 = inlined_call_operand.vmem [shape: f32[1,32], index: 3, kind: input, shape index: {}]   ;;  %s1071_s4 = inlined_call_operand.vmem [shape: f32[1,32], index: 4, kind: input, shape index: {}]   ;;  %s1072_s5 = inlined_call_operand.vmem [shape: f32[1,32], index: 5, kind: input, shape index: {}]   ;;  %s1073_s6 = inlined_call_operand.hbm [shape: f32[16,32], index: 6, kind: output, shape index: {}]  }
   0x1   :  { %1079 = sst [smem:[#allocation15_spill]] %s1069_s2 }
   0x2   :  { %11 = vsyncpa [#allocation3], 0 }
   0x3   :  { %13 = vsyncpa [#allocation3 + $0x1], 0 }
   0x4   :  { %14 = vsyncpa [#allocation6], 0 }
   0x5   :  { %16 = vsyncpa [#allocation6 + $0x1], 0 }
   0x6   :  { %17 = vsyncpa [#allocation4], 0 }
   0x7   :  { %19 = vsyncpa [#allocation4 + $0x1], 0  ;;  %s856_s21 = smov 0   ;;  %s858_s22 = smov 0  }
   0x8   :  { %s860_s23 = smov 0   ;;  %s862_s24 = smov 0  }
   0x9 LB: > { %1080 = sst [smem:[#allocation13_spill]] %s807_s23  ;;  %s877_s25 = sadd.s32 4294967295, %s811_s24   ;;  %s811_s24 = sphi %s862_s24, %s1101_s24   ;;  %s807_s23 = sphi %s860_s23, %s1098_s23   ;;  %s803_s22 = sphi %s858_s22, %s1100_s22   ;;  %s799_s21 = sphi %s856_s21, %s1099_s21  }
   0xa   : > { %s552_s26 = sadd.s32 4294967294, %s811_s24   ;;  %p45_p0 = scmp.ne.s32.totalorder %s803_s22, %s799_s21 }
   0xb   : > { %p1075_p1 = scmp.eq.s32.totalorder %s877_s25, 0  ;;  %p185_p3 = scmp.eq.s32.totalorder %s552_s26, 1 }
   0xc   : > { %p553_p5 = scmp.ge.s32.totalorder %s811_s24, 1  ;;  %p192_p7 = scmp.lt.s32.totalorder %s811_s24, 3 }
   0xd   : > { %p886_p4 = por %p1075_p1, %p45_p0  ;;  %p891_p6 = por %p185_p3, %p45_p0 }
   0xe   : > { %p896_p8 = pnand %p553_p5, %p192_p7  ;;  %s813_s30 = smov [#allocation7]  }
   0xf   : > { %s1081_s27 = scalar_select %p886_p4, 1, 0 }
  0x10   : > { %s1082_s28 = scalar_select %p891_p6, 1, 0 }
  0x11   : > { %s1083_s29 = scalar_select %p896_p8, 1, 0 }
  0x12   : > { %s204_s7 = sshll.u32 %s813_s30, 4  ;;  %p599_p9 = pneg %p896_p8  ;;  %s205_s7 = int_to_ptr.vmem [resolvable:$true] %s204_s7 }
  0x13   : > { %s910_s9 = sadd.s32 1, %s811_s24   ;;  %s32_s10 = sadd.s32 1, %s807_s23 }
  0x14   : > { %p905_p11 = pnand %p599_p9, %p1075_p1  ;;  %s29_s11 = ssub.s32 %s811_s24, %s910_s9 }
  0x15   : > { %s668_s12 = scalar_lea.vmem %s205_s7, 512  ;;  %p676_p5 = scmp.lt.s32.totalorder %s205_s7, %s205_s7 }
  0x16   : > { %p659_p12 = pneg %p905_p11  ;;  %p669_p13 = scmp.ne.s32.totalorder %s205_s7, %s668_s12 }
  0x17   : > { %p677_p7 = scmp.lt.s32.totalorder %s668_s12, %s668_s12 }
  0x18   : > { %p671_p0 = pnand %p669_p13, %p659_p12 }
  0x19   : > { %p678_p10 = por %p677_p7, %p676_p5 }
  0x1a   : > { %p672_p3 = pneg %p671_p0 }
  0x1c   : > { %p679_p2 = pnand %p678_p10, %p672_p3 }
  0x1e   : > { %682 = shalt.err (!%p679_p2)
}
  0x1f   : > { %s814_s13 = smov 128   ;;  %s815_s14 = smov 8  }
  0x20   : > { %s1085_s2 = sld [smem:[#allocation15_spill]]  ;;  %p30_p9 = scmp.eq.s32.totalorder %s29_s11, 0 }
  0x21   : > { %p39_p12 = scmp.ne.s32.totalorder %s807_s23, %s803_s22  ;;  %p40_p10 = scmp.eq.s32.totalorder %s811_s24, 0 }
  0x22   : > { %p615_p2 = scmp.lt.s32.totalorder %s811_s24, 2  ;;  %p1087_p0 = scmp.eq.s32.totalorder %s877_s25, 1 }
  0x23   : > { %s927_s17 = scalar_select %p30_p9, %s807_s23, %s32_s10  }
  0x24   : > { %p41_p13 = por %p40_p10, %p39_p12  ;;  %p931_p3 = por %p1087_p0, %p39_p12 }
  0x25   : > { %1086 = sst [smem:[#allocation14_spill]] %s927_s17  ;;  %s227_s19 = sand.u32 1, %s807_s23  }
  0x26   : > { %602 = dma.hbm_to_vmem [thread:$0]  (!%p905_p11), %s1085_s2, 512, %s205_s7, [#allocation6], %s814_s13, %s814_s13, %s815_s14  }
  0x27   : > { %s1088_s18 = scalar_select %p931_p3, 1, 0 }
  0x28   : > { %s557_s20 = sshll.u32 %s811_s24, 7  ;;  %s937_s26 = sshll.u32 %s227_s19, 3 }
  0x29   : > { %s942_s7 = scalar_lea.hbm %s1067_s0, %s557_s20  ;;  %s231_s10 = scalar_lea.vmem [#allocation2], %s937_s26 }
  0x2a   : > { %s238_s11 = sshll.u32 %s231_s10, 4  ;;  %p945_p11 = pnand %p615_p2, %p41_p13  ;;  %s239_s11 = int_to_ptr.vmem [resolvable:$true] %s238_s11 }
  0x2b   : > { %s952_s15 = scalar_lea.hbm %s1068_s1, %s557_s20  ;;  %s228_s16 = scalar_lea.sflag [#allocation3], %s227_s19 }
  0x2c   : > { %s683_s30 = scalar_lea.hbm %s942_s7, 128  ;;  %p685_p7 = pneg %p945_p11 }
  0x2d   : > { %p684_p5 = scmp.ne.s32.totalorder %s942_s7, %s683_s30  ;;  %s688_s2 = scalar_lea.hbm %s1067_s0, 256 }
  0x2e   : > { %p689_p10 = scmp.lt.s32.totalorder %s942_s7, %s1067_s0  ;;  %p690_p2 = scmp.lt.s32.totalorder %s688_s2, %s683_s30 }
  0x2f   : > { %p686_p9 = pnand %p685_p7, %p684_p5 }
  0x30   : > { %p691_p13 = por %p690_p2, %p689_p10 }
  0x31   : > { %p687_p12 = pneg %p686_p9 }
  0x33   : > { %p692_p0 = pnand %p691_p13, %p687_p12 }
  0x35   : > { %695 = shalt.err (!%p692_p0)
}
  0x36   : > { %s696_s19 = scalar_lea.vmem %s239_s11, 128  ;;  %s816_s20 = smov [#allocation2]  }
  0x37   : > { %p697_p1 = scmp.ne.s32.totalorder %s239_s11, %s696_s19  ;;  %s701_s13 = sshll.u32 %s816_s20, 4  ;;  %s702_s13 = int_to_ptr.vmem [resolvable:$false] %s701_s13 }
  0x38   : > { %s703_s14 = scalar_lea.vmem %s702_s13, 256  ;;  %p704_p9 = scmp.lt.s32.totalorder %s239_s11, %s702_s13 }
  0x39   : > { %p699_p6 = pnand %p697_p1, %p685_p7  ;;  %p705_p3 = scmp.lt.s32.totalorder %s703_s14, %s696_s19 }
  0x3b   : > { %p700_p5 = pneg %p699_p6  ;;  %p706_p4 = por %p705_p3, %p704_p9 }
  0x3d   : > { %p707_p8 = pnand %p706_p4, %p700_p5 }
  0x3f   : > { %710 = shalt.err (!%p707_p8)
}
  0x40   : > { %606 = dma.hbm_to_vmem [thread:$0]  (!%p945_p11), %s942_s7, 128, %s239_s11, %s228_s16  }
  0x41   : > { %s245_s2 = sand.u32 1, %s811_s24   ;;  %s249_s23 = scalar_lea.vmem [#allocation5], %s937_s26 }
  0x42   : > { %s256_s17 = sshll.u32 %s249_s23, 4  ;;  %s246_s30 = scalar_lea.sflag [#allocation6], %s245_s2  ;;  %s257_s17 = int_to_ptr.vmem [resolvable:$true] %s256_s17 }
  0x43   : > { %s711_s8 = scalar_lea.hbm %s952_s15, 128  ;;  %s716_s20 = scalar_lea.hbm %s1068_s1, 256 }
  0x44   : > { %p712_p1 = scmp.ne.s32.totalorder %s952_s15, %s711_s8  ;;  %p717_p8 = scmp.lt.s32.totalorder %s952_s15, %s1068_s1 }
  0x45   : > { %p718_p3 = scmp.lt.s32.totalorder %s716_s20, %s711_s8 }
  0x46   : > { %p714_p4 = pnand %p712_p1, %p685_p7 }
  0x47   : > { %p719_p12 = por %p718_p3, %p717_p8 }
  0x48   : > { %p715_p6 = pneg %p714_p4 }
  0x4a   : > { %p720_p10 = pnand %p719_p12, %p715_p6 }
  0x4c   : > { %723 = shalt.err (!%p720_p10)
}
  0x4d   : > { %s724_s26 = scalar_lea.vmem %s257_s17, 128  ;;  %s817_s7 = smov [#allocation5]  }
  0x4e   : > { %p725_p2 = scmp.ne.s32.totalorder %s257_s17, %s724_s26  ;;  %s729_s11 = sshll.u32 %s817_s7, 4  ;;  %s730_s11 = int_to_ptr.vmem [resolvable:$false] %s729_s11 }
  0x4f   : > { %s731_s16 = scalar_lea.vmem %s730_s11, 256  ;;  %p732_p5 = scmp.lt.s32.totalorder %s257_s17, %s730_s11 }
  0x50   : > { %p727_p13 = pnand %p725_p2, %p685_p7  ;;  %p733_p9 = scmp.lt.s32.totalorder %s731_s16, %s724_s26 }
  0x52   : > { %p728_p0 = pneg %p727_p13  ;;  %p734_p1 = por %p733_p9, %p732_p5 }
  0x54   : > { %p735_p4 = pnand %p734_p1, %p728_p0 }
  0x56   : > { %738 = shalt.err (!%p735_p4)
}
  0x57   : > { %609 = dma.hbm_to_vmem [thread:$0]  (!%p945_p11), %s952_s15, 128, %s257_s17, %s246_s30  }
  0x58   : > { %p1090_p6 = scmp.ne.s32.totalorder %s1083_s29, 0 }
  0x59   : > { %s997_s2 = sand.u32 (!%p1090_p6), 1, %s803_s22   ;;  %p1091_p7 = scmp.ne.s32.totalorder (!%p1090_p6), %s1081_s27, 0 }
  0x5a   : > { %265 = sbr.rel (%p1090_p6) target bundleno = 629 (0x275), region = 44  ;;  %s1000_s23 = sshll.u32 (!%p1090_p6), %s997_s2, 3 }
  0x5b   : > { %s268_s8 = scalar_lea.sflag (!%p1090_p6), [#allocation3], %s997_s2  ;;  %s271_s10 = scalar_lea.vmem (!%p1090_p6), [#allocation2], %s1000_s23 }
  0x5f   : > { %782 = dma.done.wait (%p1091_p7), %s268_s8, 128  }
  0x60   : > { %784 = vsyncadd (%p1091_p7), %s268_s8, 4294967168  ;;  %s276_s29 = sand.u32 1, %s877_s25   ;;  %s280_s15 = scalar_lea.vmem [#allocation5], %s1000_s23 }
  0x61   : > { %s277_s12 = scalar_lea.sflag [#allocation6], %s276_s29 }
  0x62   : > { %786 = dma.done.wait (%p1091_p7), %s277_s12, 128  }
  0x63   : > { %788 = vsyncadd (%p1091_p7), %s277_s12, 4294967168  ;;  %p1092_p11 = scmp.eq.s32.totalorder %s877_s25, 0 }
  0x65   : > { %790 = dma.done.wait (%p1092_p11), [#allocation6], 512   ;;  %p1093_p8 = pmov %p1092_p11 }
  0x66   : > { %v818_v0 = vmov 0.0   ;;  %vm819_vm0 = vmmov 0   ;;  %v322_v1 = vld [vmem:[#allocation7 + $0x18] sm:$0xff]  ;;  %v321_v2 = vld [vmem:[#allocation7 + $0x10] sm:$0xff]  ;;  %v320_v3 = vld [vmem:[#allocation7 + $0x8] sm:$0xff]  ;;  %vm330_vm1 = vcmask 261120  }
  0x67   : > { %792 = vsyncadd (%p1093_p8), [#allocation6], 4294966784  ;;  %578 = vmatprep.subr.mxu0 %v818_v0  ;;  %586 = vmatprep.mubr.msk.f32.mxu0 %vm819_vm0, %v818_v0  ;;  %v319_v4 = vld [vmem:[#allocation7] sm:$0xff]  ;;  %v404_v8 = vld [vmem:[%s280_s15] sm:$0xff]  ;;  %s570_s14 = sshll.u32 %s877_s25, 7  ;;  %s317_s26 = scalar_lea.vmem [#allocation8], %s1000_s23 }
  0x68   : > { %579 = vmatpush3.msra.mxu0 %v322_v1  ;;  %v318_v5 = vld [vmem:[%s271_s10] sm:$0xff]  ;;  %s450_s7 = sshll.u32 %s317_s26, 4  ;;  %s448_s8 = scalar_lea.hbm %s1073_s6, %s570_s14  ;;  %s451_s7 = int_to_ptr.vmem [resolvable:$true] %s450_s7 }
  0x69   : > { %580 = vmatprep.subr.mxu0 %v818_v0  ;;  %v565_v6 = vld [vmem:[%s1070_s3] ss:$0 sm:$0xff]  ;;  %s437_s10 = scalar_lea.sflag [#allocation4], %s997_s2  ;;  %s739_s29 = scalar_lea.vmem %s451_s7, 128 }
  0x6a   : > { %581 = vmatpush3.msra.mxu0 %v321_v2  ;;  %v567_v22 = vld [vmem:[%s1071_s4] ss:$0 sm:$0xff]  ;;  %p740_p3 = scmp.ne.s32.totalorder %s451_s7, %s739_s29  ;;  %p1094_p12 = scmp.ne.s32.totalorder %s1088_s18, 0 }
  0x6b   : > { %582 = vmatprep.subr.mxu0 %v818_v0  ;;  %v568_v24 = vld [vmem:[%s1072_s5] ss:$0 sm:$0xff]  ;;  %s820_s12 = smov [#allocation8]  }
  0x6c   : > { %583 = vmatpush3.msra.mxu0 %v320_v3  ;;  %p741_p10 = pnand %p740_p3, %p1094_p12  ;;  %s743_s15 = sshll.u32 %s820_s12, 4  ;;  %s744_s15 = int_to_ptr.vmem [resolvable:$false] %s743_s15 }
  0x6d   : > { %584 = vmatprep.subr.mxu0 %v818_v0  ;;  %s745_s25 = scalar_lea.vmem %s744_s15, 256  ;;  %p746_p13 = scmp.lt.s32.totalorder %s451_s7, %s744_s15 }
  0x6e   : > { %585 = vmatpush3.msra.mxu0 %v319_v4  ;;  %p742_p2 = pneg %p741_p10  ;;  %p747_p0 = scmp.lt.s32.totalorder %s745_s25, %s739_s29 }
  0x6f   : > { %587 = vmatmul.mubr.msk.f32.vlgmr.msra.gmra.mxu0 %vm330_vm1, %v318_v5 }
  0x70   : > { %p748_p5 = por %p747_p0, %p746_p13 }
  0x72   : > { %p749_p9 = pnand %p748_p5, %p742_p2 }
 0x12f   : > { %v400_v7 = vpop.f32.mrf.mxu0 }
 0x130   : > { %v401_v9 = vadd.f32 %v565_v6, %v400_v7 }
 0x131   : > { %v588_v10 = vpop.f32.mrf.mxu0 }
 0x132   : > { %v405_v11 = vadd.f32 %v404_v8, %v401_v9 }
 0x134   : > { %v406_v12 = vsel %vm330_vm1, %v405_v11, 0.0 }
 0x135   : > { %407 = vadd.xlane.f32.xlu0 %v406_v12 }
 0x1be   : > { %v408_v13 = vpop.xlane.xlu0 %407 }
 0x1bf   : > { %v409_v14 = vmul.f32 0.03125, %v408_v13 }
 0x1c1   : > { %v410_v15 = vsub.f32 %v405_v11, %v409_v14 }
 0x1c3   : > { %v411_v16 = vmul.f32 %v410_v15, %v410_v15 }
 0x1c5   : > { %v412_v17 = vsel %vm330_vm1, %v411_v16, 0.0 }
 0x1c6   : > { %413 = vadd.xlane.f32.xlu0 %v412_v17 }
 0x24f   : > { %v414_v18 = vpop.xlane.xlu0 %413 }
 0x250   : > { %v415_v19 = vmul.f32 0.03125, %v414_v18 }
 0x252   : > { %v416_v20 = vadd.f32 1e-12, %v415_v19 }
 0x254   : > { %655 = vrsqrt.f32 %v416_v20 }
 0x261   : > { %v656_v21 = vpop.eup %655 }
 0x262   : > { %v418_v23 = vmul.f32 %v656_v21, %v410_v15 }
 0x264   : > { %v426_v25 = vmul.f32 %v567_v22, %v418_v23 }
 0x266   : > { %v434_v26 = vadd.f32 %v568_v24, %v426_v25 }
 0x268   : > { %435 = vst.msk [vmem:[%s317_s26] sm:$0xff] %vm330_vm1, %v434_v26 }
 0x269   : > { %752 = shalt.err (!%p749_p9)
}
 0x26a   : > { %s753_s23 = scalar_lea.hbm %s448_s8, 128  ;;  %s757_s17 = scalar_lea.hbm %s1073_s6, 256 }
 0x26b   : > { %p754_p1 = scmp.ne.s32.totalorder %s448_s8, %s753_s23  ;;  %p758_p7 = scmp.lt.s32.totalorder %s448_s8, %s1073_s6 }
 0x26c   : > { %p759_p11 = scmp.lt.s32.totalorder %s757_s17, %s753_s23 }
 0x26d   : > { %p755_p4 = pnand %p754_p1, %p1094_p12 }
 0x26e   : > { %p760_p8 = por %p759_p11, %p758_p7 }
 0x26f   : > { %p756_p6 = pneg %p755_p4 }
 0x271   : > { %p761_p3 = pnand %p760_p8, %p756_p6 }
 0x273   : > { %764 = shalt.err (!%p761_p3)
}
 0x274   : > { %597 = dma.vmem_to_hbm [thread:$0]  (%p1094_p12), %s451_s7, 128, %s448_s8, %s437_s10  }
 0x275 PF: > { %s462_s20 = sand.u32 1, %s799_s21   ;;  %p1095_p10 = scmp.ne.s32.totalorder %s1082_s28, 0 }
 0x276   : > { %p1096_p2 = scmp.ge.s32.totalorder %s811_s24, 2  ;;  %s463_s13 = scalar_lea.sflag [#allocation4], %s462_s20 }
 0x278   : > { %p611_p13 = pnand %p1096_p2, %p1095_p10 }
 0x27a   : > { %p612_p0 = pneg %p611_p13 }
 0x27c   : > { %794 = dma.done.wait (%p612_p0), %s463_s13, 128  }
 0x27d   : > { %796 = vsyncadd (%p612_p0), %s463_s13, 4294967168  ;;  %s1097_s14 = sld [smem:[#allocation13_spill]]  ;;  %p22_p5 = scmp.ge.s32.totalorder %s910_s9, 4  }
 0x27e   : > { %s1098_s23 = sld [smem:[#allocation14_spill]]  ;;  %s1099_s21 = smov %s803_s22 }
 0x27f   : > { %s1101_s24 = smov %s910_s9  ;;  %24 = sbr.rel (!%p22_p5) target bundleno = 9 (0x9), region = 106 }
 0x283   : > { %s1100_s22 = smov %s1097_s14 }
 0x284   :  { %468 = vsyncpa [#allocation3], 1 }
 0x285   :  { %470 = vsyncpa [#allocation3 + $0x1], 1 }
 0x286   :  { %471 = vsyncpa [#allocation6], 1 }
 0x287   :  { %473 = vsyncpa [#allocation6 + $0x1], 1 }
 0x288   :  { %474 = vsyncpa [#allocation4], 1 }
 0x289   :  { %476 = vsyncpa [#allocation4 + $0x1], 1 }

</bundles_post_ra>
